<compile_context>
chip_gen: v7x
topology: tpu7x:2x2x1
jax: 0.10.0
libtpu: 0.0.40
codegen_flags: <defaults>
</compile_context>

<pallas_src>
import functools
import math

import jax
import jax.numpy as jnp
from jax.experimental import pallas as pl
from jax.experimental.pallas import tpu as pltpu


def _pick_tile(n, candidates=(512, 256, 128)):
    """Largest MXU-friendly tile dividing n; fall back to n (monolithic)."""
    for c in candidates:
        if n % c == 0:
            return c
    return n


# ---------------------------------------------------------------------------
# Kernel 1: z = normalize(relu(x @ W1^T + b1) @ W2^T + b2, dim=1) / sqrt(tau)
# ---------------------------------------------------------------------------
def _mlp_normalize_kernel(x_ref, w1_ref, b1_ref, w2_ref, b2_ref, z_ref, *,
                          inv_sqrt_tau):
    # Contract last dims of both operands (== x @ W^T) -> MXU, no transpose.
    dn = (((1,), (1,)), ((), ()))
    h = jax.lax.dot_general(x_ref[...], w1_ref[...], dn,
                            preferred_element_type=jnp.float32)
    h = jnp.maximum(h + b1_ref[...], 0.0)
    z = jax.lax.dot_general(h.astype(jnp.bfloat16), w2_ref[...], dn,
                            preferred_element_type=jnp.float32)
    z = z + b2_ref[...]
    # F.normalize(z, p=2, dim=1) / sqrt(tau): fused rsqrt + single multiply.
    # (clamp sum-of-squares at 1e-24 == clamping the norm at 1e-12)
    sumsq = jnp.sum(z * z, axis=1, keepdims=True)
    inv = jax.lax.rsqrt(jnp.maximum(sumsq, 1e-24)) * inv_sqrt_tau
    z_ref[...] = (z * inv).astype(z_ref.dtype)


# ---------------------------------------------------------------------------
# Kernel 2: flash-style log-softmax over sim = z @ z^T, diagonal masked,
# accumulating per-row -logprob[i, label_i] with label_i = (i + n//2) % n.
# ---------------------------------------------------------------------------
def _ntxent_flash_kernel(zq_ref, zk_ref, out_ref, m_sc, l_sc, p_sc, *,
                         n, tq, tk):
    qi = pl.program_id(0)
    ki = pl.program_id(1)

    @pl.when(ki == 0)
    def _():
        m_sc[...] = jnp.full_like(m_sc, -jnp.inf)
        l_sc[...] = jnp.zeros_like(l_sc)
        p_sc[...] = jnp.zeros_like(p_sc)

    # (tq, tk) block of the similarity matrix: bf16 operands, f32 accumulate,
    # contraction on the last dim of both (no transpose materialized).
    sim = jax.lax.dot_general(zq_ref[...], zk_ref[...], (((1,), (1,)), ((), ())),
                              preferred_element_type=jnp.float32)

    row = qi * tq + jax.lax.broadcasted_iota(jnp.int32, (tq, tk), 0)
    col = ki * tk + jax.lax.broadcasted_iota(jnp.int32, (tq, tk), 1)
    sim = jnp.where(row == col, jnp.float32(-1e9), sim)

    # Positive-pair similarity via one-hot mask (exactly one hit per row
    # across all k tiles) -- logprob is never materialized.
    label_mask = col == ((row + (n // 2)) % n)
    p_sc[...] += jnp.sum(jnp.where(label_mask, sim, 0.0), axis=1, keepdims=True)

    # Online (flash) log-sum-exp across k tiles.
    m_prev = m_sc[...]
    m_new = jnp.maximum(m_prev, jnp.max(sim, axis=1, keepdims=True))
    l_sc[...] = (l_sc[...] * jnp.exp(m_prev - m_new)
                 + jnp.sum(jnp.exp(sim - m_new), axis=1, keepdims=True))
    m_sc[...] = m_new

    @pl.when(ki == pl.num_programs(1) - 1)
    def _():
        lse = m_sc[...] + jnp.log(l_sc[...])
        out_ref[...] = lse - p_sc[...]          # per-row -logprob[i, label_i]


# ---------------------------------------------------------------------------
# Wrapper
# ---------------------------------------------------------------------------
def ntxent_loss(x, w1, b1, w2, b2, tau=1.0):
    """x: (n, H) f32. w1, w2: (H, H) PyTorch nn.Linear weights; b1, b2: (H,)."""
    n, hidden = x.shape

    # bf16 MXU operands (cast once in the wrapper -> halves HBM/VMEM traffic);
    # biases stay f32.
    x_bf = x.astype(jnp.bfloat16)
    w1_bf = w1.astype(jnp.bfloat16)
    w2_bf = w2.astype(jnp.bfloat16)
    b1_2d = b1.reshape(1, hidden).astype(jnp.float32)
    b2_2d = b2.reshape(1, hidden).astype(jnp.float32)

    vmem_limit = 48 * 1024 * 1024  # explicit budget, safe on v5e/v6e/v7x

    # --- Stage 1: MLP + normalize, grid over row tiles --------------------
    tm = _pick_tile(n)
    mlp_kernel = functools.partial(_mlp_normalize_kernel,
                                   inv_sqrt_tau=float(1.0 / math.sqrt(tau)))
    mlp_cost = pl.CostEstimate(
        flops=4 * n * hidden * hidden,
        transcendentals=n,
        bytes_accessed=2 * n * hidden * 2 + 2 * hidden * hidden * 2 + 8 * hidden)
    z = pl.pallas_call(
        mlp_kernel,
        out_shape=jax.ShapeDtypeStruct((n, hidden), jnp.bfloat16),
        grid_spec=pltpu.PrefetchScalarGridSpec(
            num_scalar_prefetch=0,
            grid=(n // tm,),
            in_specs=[
                pl.BlockSpec((tm, hidden), lambda i: (i, 0)),       # x row tile
                pl.BlockSpec((hidden, hidden), lambda i: (0, 0)),   # W1 (resident)
                pl.BlockSpec((1, hidden), lambda i: (0, 0)),        # b1
                pl.BlockSpec((hidden, hidden), lambda i: (0, 0)),   # W2 (resident)
                pl.BlockSpec((1, hidden), lambda i: (0, 0)),        # b2
            ],
            out_specs=pl.BlockSpec((tm, hidden), lambda i: (i, 0)),
        ),
        compiler_params=pltpu.CompilerParams(
            dimension_semantics=("parallel",),
            vmem_limit_bytes=vmem_limit),
        cost_estimate=mlp_cost,
    )(x_bf, w1_bf, b1_2d, w2_bf, b2_2d)

    # --- Stage 2: flash log-softmax loss, grid over (q tiles, k tiles) ----
    tq = _pick_tile(n)
    tk = tq
    nq, nk = n // tq, n // tk
    flash_kernel = functools.partial(_ntxent_flash_kernel, n=n, tq=tq, tk=tk)
    flash_cost = pl.CostEstimate(
        flops=2 * n * n * hidden,
        transcendentals=n * n + 2 * n,
        bytes_accessed=n * hidden * 2 + nq * n * hidden * 2 + n * 4)
    per_row = pl.pallas_call(
        flash_kernel,
        out_shape=jax.ShapeDtypeStruct((n, 1), jnp.float32),
        grid_spec=pltpu.PrefetchScalarGridSpec(
            num_scalar_prefetch=0,
            grid=(nq, nk),
            in_specs=[
                pl.BlockSpec((tq, hidden), lambda qi, ki: (qi, 0)),  # z q-tile
                pl.BlockSpec((tk, hidden), lambda qi, ki: (ki, 0)),  # z k-tile
            ],
            out_specs=pl.BlockSpec((tq, 1), lambda qi, ki: (qi, 0)),
            scratch_shapes=[pltpu.VMEM((tq, 1), jnp.float32)] * 3,   # m, l, picked
        ),
        compiler_params=pltpu.CompilerParams(
            dimension_semantics=("parallel", "arbitrary"),
            vmem_limit_bytes=vmem_limit),
        cost_estimate=flash_cost,
    )(z, z)

    # loss = -sum_i logprob[i, label_i] / n / (m-1) / norm   (m=2, norm=1.0)
    return jnp.sum(per_row) / jnp.float32(n)


# ---------------------------------------------------------------------------
# References
# ---------------------------------------------------------------------------
def _reference_f32(x, w1, b1, w2, b2, tau=1.0):
    # Pure-f32 JAX reference of the PyTorch forward (dropout = identity).
    h = jnp.maximum(x @ w1.T + b1, 0.0)
    z = h @ w2.T + b2
    z = z / jnp.maximum(jnp.linalg.norm(z, axis=1, keepdims=True), 1e-12)
    z = z / jnp.sqrt(tau)
    n = x.shape[0]
    sim = z @ z.T
    sim = sim.at[jnp.arange(n), jnp.arange(n)].set(-1e9)
    logprob = jax.nn.log_softmax(sim, axis=1)
    labels = (jnp.arange(n) + n // 2) % n
    return -logprob[jnp.arange(n), labels].sum() / n


def _reference_bf16_matmuls(x, w1, b1, w2, b2, tau=1.0):
    # Mirrors the kernel's precision choices (bf16 MXU operands, f32 elsewhere).
    dn = (((1,), (1,)), ((), ()))
    xb, w1b, w2b = (a.astype(jnp.bfloat16) for a in (x, w1, w2))
    h = jax.lax.dot_general(xb, w1b, dn, preferred_element_type=jnp.float32) + b1
    h = jnp.maximum(h, 0.0)
    z = jax.lax.dot_general(h.astype(jnp.bfloat16), w2b, dn,
                            preferred_element_type=jnp.float32) + b2
    sumsq = jnp.sum(z * z, axis=1, keepdims=True)
    z = (z * (jax.lax.rsqrt(jnp.maximum(sumsq, 1e-24)) / jnp.sqrt(tau))
         ).astype(jnp.bfloat16)
    sim = jax.lax.dot_general(z, z, dn, preferred_element_type=jnp.float32)
    n = x.shape[0]
    sim = sim.at[jnp.arange(n), jnp.arange(n)].set(-1e9)
    logprob = jax.nn.log_softmax(sim, axis=1)
    labels = (jnp.arange(n) + n // 2) % n
    return -logprob[jnp.arange(n), labels].sum() / n


if __name__ == "__main__":
    n, hidden = 8, 32  # batch, args.hidden_size (small demo shapes)
    tau = 1.0

    key = jax.random.PRNGKey(0)
    kx, k1, k2, k3, k4 = jax.random.split(key, 5)
    bound = 1.0 / jnp.sqrt(hidden)  # PyTorch Linear default init range
    x = jax.random.normal(kx, (n, hidden), dtype=jnp.float32)
    w1 = jax.random.uniform(k1, (hidden, hidden), jnp.float32, -bound, bound)
    b1 = jax.random.uniform(k2, (hidden,), jnp.float32, -bound, bound)
    w2 = jax.random.uniform(k3, (hidden, hidden), jnp.float32, -bound, bound)
    b2 = jax.random.uniform(k4, (hidden,), jnp.float32, -bound, bound)

    loss = ntxent_loss(x, w1, b1, w2, b2, tau=tau)
    jax.block_until_ready(loss)

    ref_mirror = _reference_bf16_matmuls(x, w1, b1, w2, b2, tau=tau)
    ref_f32 = _reference_f32(x, w1, b1, w2, b2, tau=tau)
    # Tight check against a reference with identical precision choices.
    assert jnp.allclose(loss, ref_mirror, atol=1e-3, rtol=1e-3), (loss, ref_mirror)
    # Looser check against the full-f32 PyTorch-equivalent reference
    # (bf16 MXU operands widen the tolerance).
    assert jnp.allclose(loss, ref_f32, atol=5e-2, rtol=5e-2), (loss, ref_f32)

    print("KERNEL_OK")
</pallas_src>

<mosaic_0001>
module attributes {stable_mosaic.version = 11 : i64} {
  func.func @_mlp_normalize_kernel(%arg0: i32, %arg1: memref<8x32xbf16, #tpu.memory_space<vmem>>, %arg2: memref<32x32xbf16, #tpu.memory_space<vmem>>, %arg3: memref<1x32xf32, #tpu.memory_space<vmem>>, %arg4: memref<32x32xbf16, #tpu.memory_space<vmem>>, %arg5: memref<1x32xf32, #tpu.memory_space<vmem>>, %arg6: memref<8x32xbf16, #tpu.memory_space<vmem>>) attributes {dimension_semantics = [#tpu.dimension_semantics<parallel>], iteration_bounds = array<i64: 1>, scalar_prefetch = 0 : i64, scratch_operands = 0 : i64, tpu.core_type = #tpu.core_type<tc>, window_params = [{transform_indices = @transform_0, window_bounds = array<i64: 8, 32>}, {pipeline_mode = #tpu.pipeline_mode<synchronous>, transform_indices = @transform_1, window_bounds = array<i64: 32, 32>}, {pipeline_mode = #tpu.pipeline_mode<synchronous>, transform_indices = @transform_2, window_bounds = array<i64: 1, 32>}, {pipeline_mode = #tpu.pipeline_mode<synchronous>, transform_indices = @transform_3, window_bounds = array<i64: 32, 32>}, {pipeline_mode = #tpu.pipeline_mode<synchronous>, transform_indices = @transform_4, window_bounds = array<i64: 1, 32>}, {transform_indices = @transform_5, window_bounds = array<i64: 8, 32>}]} {
    %c0 = arith.constant 0 : index
    %c0_0 = arith.constant 0 : index
    %0 = vector.load %arg1[%c0, %c0_0] : memref<8x32xbf16, #tpu.memory_space<vmem>>, vector<8x32xbf16>
    %c0_1 = arith.constant 0 : index
    %c0_2 = arith.constant 0 : index
    %1 = vector.load %arg2[%c0_1, %c0_2] : memref<32x32xbf16, #tpu.memory_space<vmem>>, vector<32x32xbf16>
    %cst = arith.constant dense<0.000000e+00> : vector<8x32xf32>
    %2 = tpu.matmul %0, %1, %cst {dimension_numbers = #tpu.dot_dimension_numbers<[1], [1], [0], [0], [0, 0, 1, 0], [], []>} : vector<8x32xbf16>, vector<32x32xbf16>, vector<8x32xf32> -> vector<8x32xf32>
    %c0_3 = arith.constant 0 : index
    %c0_4 = arith.constant 0 : index
    %3 = vector.load %arg3[%c0_3, %c0_4] : memref<1x32xf32, #tpu.memory_space<vmem>>, vector<1x32xf32>
    %4 = vector.broadcast %3 : vector<1x32xf32> to vector<8x32xf32>
    %5 = arith.addf %2, %4 : vector<8x32xf32>
    %cst_5 = arith.constant 0.000000e+00 : f32
    %6 = vector.broadcast %cst_5 : f32 to vector<8x32xf32>
    %7 = arith.maximumf %5, %6 : vector<8x32xf32>
    %8 = arith.truncf %7 : vector<8x32xf32> to vector<8x32xbf16>
    %c0_6 = arith.constant 0 : index
    %c0_7 = arith.constant 0 : index
    %9 = vector.load %arg4[%c0_6, %c0_7] : memref<32x32xbf16, #tpu.memory_space<vmem>>, vector<32x32xbf16>
    %cst_8 = arith.constant dense<0.000000e+00> : vector<8x32xf32>
    %10 = tpu.matmul %8, %9, %cst_8 {dimension_numbers = #tpu.dot_dimension_numbers<[1], [1], [0], [0], [0, 0, 1, 0], [], []>} : vector<8x32xbf16>, vector<32x32xbf16>, vector<8x32xf32> -> vector<8x32xf32>
    %c0_9 = arith.constant 0 : index
    %c0_10 = arith.constant 0 : index
    %11 = vector.load %arg5[%c0_9, %c0_10] : memref<1x32xf32, #tpu.memory_space<vmem>>, vector<1x32xf32>
    %12 = vector.broadcast %11 : vector<1x32xf32> to vector<8x32xf32>
    %13 = arith.addf %10, %12 : vector<8x32xf32>
    %14 = arith.mulf %13, %13 : vector<8x32xf32>
    %cst_11 = arith.constant dense<0.000000e+00> : vector<8xf32>
    %15 = vector.multi_reduction <add>, %14, %cst_11 [1] : vector<8x32xf32> to vector<8xf32>
    %16 = vector.shape_cast %15 : vector<8xf32> to vector<8x1xf32>
    %cst_12 = arith.constant 1.000000e-24 : f32
    %17 = vector.broadcast %cst_12 : f32 to vector<8x1xf32>
    %18 = arith.maximumf %16, %17 : vector<8x1xf32>
    %19 = math.rsqrt %18 : vector<8x1xf32>
    %cst_13 = arith.constant 1.000000e+00 : f32
    %20 = vector.broadcast %cst_13 : f32 to vector<8x1xf32>
    %21 = arith.mulf %19, %20 : vector<8x1xf32>
    %22 = vector.broadcast %21 : vector<8x1xf32> to vector<8x32xf32>
    %23 = arith.mulf %13, %22 : vector<8x32xf32>
    %24 = arith.truncf %23 : vector<8x32xf32> to vector<8x32xbf16>
    %c0_14 = arith.constant 0 : index
    %c0_15 = arith.constant 0 : index
    %25 = vector.load %arg6[%c0_14, %c0_15] : memref<8x32xbf16, #tpu.memory_space<vmem>>, vector<8x32xbf16>
    tpu.vector_store %arg6[%c0_14, %c0_15], %24 {strides = array<i32>} : memref<8x32xbf16, #tpu.memory_space<vmem>>, vector<8x32xbf16>,
    return
  }
  func.func @transform_0(%arg0: i32) -> (i32, i32) {
    %c0_i32 = arith.constant 0 : i32
    %c0_i32_0 = arith.constant 0 : i32
    return %arg0, %c0_i32 : i32, i32
  }
  func.func @transform_1(%arg0: i32) -> (i32, i32) {
    %c0_i32 = arith.constant 0 : i32
    %c0_i32_0 = arith.constant 0 : i32
    %c0_i32_1 = arith.constant 0 : i32
    return %c0_i32, %c0_i32_0 : i32, i32
  }
  func.func @transform_2(%arg0: i32) -> (i32, i32) {
    %c0_i32 = arith.constant 0 : i32
    %c0_i32_0 = arith.constant 0 : i32
    %c0_i32_1 = arith.constant 0 : i32
    return %c0_i32, %c0_i32_0 : i32, i32
  }
  func.func @transform_3(%arg0: i32) -> (i32, i32) {
    %c0_i32 = arith.constant 0 : i32
    %c0_i32_0 = arith.constant 0 : i32
    %c0_i32_1 = arith.constant 0 : i32
    return %c0_i32, %c0_i32_0 : i32, i32
  }
  func.func @transform_4(%arg0: i32) -> (i32, i32) {
    %c0_i32 = arith.constant 0 : i32
    %c0_i32_0 = arith.constant 0 : i32
    %c0_i32_1 = arith.constant 0 : i32
    return %c0_i32, %c0_i32_0 : i32, i32
  }
  func.func @transform_5(%arg0: i32) -> (i32, i32) {
    %c0_i32 = arith.constant 0 : i32
    %c0_i32_0 = arith.constant 0 : i32
    return %arg0, %c0_i32 : i32, i32
  }
}

</mosaic_0001>

<bundles_post_ra>
// kernel: tpu_custom_call.1
= control target key start
LH: loop header
LB: loop body
LE: loop exit
PB: predicated region body
PF: predicated region fallthrough
CT: control target
= control target key end

     0   :  { %10 = vsyncpa [#allocation3], 0  ;;  %s474_s0 = inlined_call_operand.hbm [shape: bf16[8,32], index: 0, kind: input, shape index: {}]   ;;  %s475_s1 = inlined_call_operand.hbm [shape: bf16[32,32], index: 1, kind: input, shape index: {}]   ;;  %s476_s2 = inlined_call_operand.vmem [shape: f32[1,32], index: 2, kind: input, shape index: {}]   ;;  %s477_s3 = inlined_call_operand.hbm [shape: bf16[32,32], index: 3, kind: input, shape index: {}]   ;;  %s478_s4 = inlined_call_operand.vmem [shape: f32[1,32], index: 4, kind: input, shape index: {}]   ;;  %s479_s5 = inlined_call_operand.hbm [shape: bf16[8,32], index: 5, kind: output, shape index: {}]  }
   0x1   :  { %11 = vsyncpa [#allocation6], 0 }
   0x2   :  { %12 = vsyncpa [#allocation4], 0  ;;  %s369_s18 = smov [#allocation5]   ;;  %s275_s22 = scalar_lea.hbm %s475_s1, 256 }
   0x3   :  { %s28_s19 = sshll.u32 %s369_s18, 4  ;;  %p276_p0 = scmp.ne.s32.totalorder %s475_s1, %s275_s22  ;;  %s29_s19 = int_to_ptr.vmem [resolvable:$true] %s28_s19 }
   0x4   :  { %p279_p1 = scmp.lt.u32.totalorder %s275_s22, %s475_s1 }
   0x6   :  { %p281_p2 = pnand %p279_p1, %p276_p0 }
   0x8   :  { %284 = shalt.err (!%p281_p2)
}
   0x9   :  { %s285_s27 = scalar_lea.vmem %s29_s19, 256  ;;  %p290_p4 = scmp.lt.s32.totalorder %s29_s19, %s29_s19 }
   0xa   :  { %p286_p3 = scmp.ne.s32.totalorder %s29_s19, %s285_s27  ;;  %p291_p5 = scmp.lt.s32.totalorder %s285_s27, %s285_s27 }
   0xc   :  { %p292_p6 = por %p291_p5, %p290_p4 }
   0xe   :  { %p293_p7 = pnand %p292_p6, %p286_p3 }
  0x10   :  { %296 = shalt.err (!%p293_p7)
}
  0x11   :  { %s370_s28 = smov 64   ;;  %s371_s29 = smov 4  }
  0x12   :  { %34 = dma.hbm_to_vmem [thread:$0]  %s475_s1, 256, %s29_s19, [#allocation6], %s370_s28, %s370_s28, %s371_s29  }
  0x13   :  { %s372_s7 = smov [#allocation2]   ;;  %s373_s9 = smov [#allocation7]  }
  0x14   :  { %s19_s8 = sshll.u32 %s372_s7, 4  ;;  %s42_s10 = sshll.u32 %s373_s9, 4  ;;  %s20_s8 = int_to_ptr.vmem [resolvable:$true] %s19_s8  ;;  %s43_s10 = int_to_ptr.vmem [resolvable:$true] %s42_s10 }
  0x15   :  { %s297_s13 = scalar_lea.hbm %s474_s0, 64 }
  0x16   :  { %p298_p8 = scmp.ne.s32.totalorder %s474_s0, %s297_s13  ;;  %p301_p9 = scmp.lt.u32.totalorder %s297_s13, %s474_s0 }
  0x18   :  { %p303_p10 = pnand %p301_p9, %p298_p8 }
  0x1a   :  { %306 = shalt.err (!%p303_p10)
}
  0x1b   :  { %s307_s1 = scalar_lea.vmem %s20_s8, 64  ;;  %p312_p12 = scmp.lt.s32.totalorder %s20_s8, %s20_s8 }
  0x1c   :  { %p308_p11 = scmp.ne.s32.totalorder %s20_s8, %s307_s1  ;;  %p313_p13 = scmp.lt.s32.totalorder %s307_s1, %s307_s1 }
  0x1e   :  { %p314_p0 = por %p313_p13, %p312_p12 }
  0x20   :  { %p315_p1 = pnand %p314_p0, %p308_p11 }
  0x22   :  { %318 = shalt.err (!%p315_p1)
}
  0x23   :  { %22 = dma.hbm_to_vmem [thread:$0]  %s474_s0, 64, %s20_s8, [#allocation3]  }
  0x24   :  { %s319_s22 = scalar_lea.hbm %s477_s3, 256 }
  0x25   :  { %p320_p2 = scmp.ne.s32.totalorder %s477_s3, %s319_s22  ;;  %p323_p3 = scmp.lt.u32.totalorder %s319_s22, %s477_s3 }
  0x27   :  { %p325_p4 = pnand %p323_p3, %p320_p2 }
  0x29   :  { %328 = shalt.err (!%p325_p4)
}
  0x2a   :  { %s329_s27 = scalar_lea.vmem %s43_s10, 256  ;;  %p334_p6 = scmp.lt.s32.totalorder %s43_s10, %s43_s10 }
  0x2b   :  { %p330_p5 = scmp.ne.s32.totalorder %s43_s10, %s329_s27  ;;  %p335_p7 = scmp.lt.s32.totalorder %s329_s27, %s329_s27 }
  0x2d   :  { %p336_p8 = por %p335_p7, %p334_p6 }
  0x2f   :  { %p337_p9 = pnand %p336_p8, %p330_p5 }
  0x31   :  { %340 = shalt.err (!%p337_p9)
}
  0x32   :  { %48 = dma.hbm_to_vmem [thread:$0]  %s477_s3, 256, %s43_s10, [#allocation6], %s370_s28, %s370_s28, %s371_s29  }
  0x33   :  { %363 = dma.done.wait [#allocation3], 64  }
  0x34   :  { %364 = vsyncadd [#allocation3], 4294967232 }
  0x35   :  { %365 = dma.done.wait [#allocation6], 512  }
  0x36   :  { %366 = vsyncadd [#allocation6], 4294966784  ;;  %v374_v0 = vmov 0.0   ;;  %vm375_vm0 = vmmov 0   ;;  %vm83_vm1 = vcmask 261120   ;;  %v269_v1 = vld [vmem:[#allocation5] sm:$0xff]  }
  0x37   :  { %245 = vmatprep.subr.bf16.mxu0 %v374_v0  ;;  %249 = vmatprep.mubr.msk.bf16.mxu0 %vm375_vm0, %v374_v0  ;;  %v88_v2 = vsel %vm83_vm1, %v269_v1, 0  ;;  %v271_v3 = vld [vmem:[#allocation7] sm:$0xff]   ;;  %v270_v4 = vld [vmem:[#allocation5 + $0x8] sm:$0xff]   ;;  %v61_v7 = vld [vmem:[#allocation2] sm:$0xf]  ;;  %vm213_vm2 = vcmask 257024  }
  0x38   :  { %253 = vmatprep.subr.bf16.mxu1 %v374_v0  ;;  %257 = vmatprep.mubr.msk.bf16.mxu1 %vm375_vm0, %v374_v0  ;;  %v160_v5 = vsel %vm83_vm1, %v271_v3, 0  ;;  %v91_v6 = vsel %vm83_vm1, %v270_v4, 0  ;;  %v272_v8 = vld [vmem:[#allocation7 + $0x8] sm:$0xff]  }
  0x39   :  { %246 = vmatpush3.bf16.xpose.msra.mxu0 %v88_v2  ;;  %254 = vmatpush3.bf16.xpose.msra.mxu1 %v160_v5  ;;  %v163_v9 = vsel %vm83_vm1, %v272_v8, 0  ;;  %v231_v10 = vld [vmem:[%s476_s2] ss:$0 sm:$0xff]  ;;  %s376_s2 = smov [#allocation8]  }
  0x3a   :  { %247 = vmatprep.subr.bf16.mxu0 %v374_v0  ;;  %255 = vmatprep.subr.bf16.mxu1 %v374_v0  ;;  %v235_v18 = vld [vmem:[%s478_s4] ss:$0 sm:$0xff]  ;;  %s221_s7 = sshll.u32 %s376_s2, 4  ;;  %s222_s7 = int_to_ptr.vmem [resolvable:$true] %s221_s7 }
  0x3b   :  { %s341_s4 = scalar_lea.vmem %s222_s7, 64  ;;  %p346_p11 = scmp.lt.s32.totalorder %s222_s7, %s222_s7 }
  0x3c   :  { %p342_p10 = scmp.ne.s32.totalorder %s222_s7, %s341_s4  ;;  %p347_p12 = scmp.lt.s32.totalorder %s341_s4, %s341_s4 }
  0x3e   :  { %p348_p13 = por %p347_p12, %p346_p11 }
  0x40   :  { %p349_p0 = pnand %p348_p13, %p342_p10 }
  0x41   :  { %248 = vmatpush3.bf16.xpose.msra.mxu0 %v91_v6  ;;  %256 = vmatpush3.bf16.xpose.msra.mxu1 %v163_v9 }
  0x48   :  { %250 = vmatmul.mubr.msk.bf16.vlgmr.msra.gmra.mrb[0].mxu0 %vm83_vm1, %v61_v7 }
 0x11b   :  { %v127_v11 = vpop.f32.mrb[0].mxu0 }
 0x11c   :  { %v128_v12 = vadd.f32 %v231_v10, %v127_v11  ;;  %v251_v13 = vpop.f32.mrb[1].mxu0 }
 0x11d   :  { %v130_v14 = vpop.f32.mrb[2].mxu0 }
 0x11e   :  { %v133_v15 = vmax.f32 %v128_v12, 0.0  ;;  %v252_v16 = vpop.f32.mrb[3].mxu0 }
 0x120   :  { %v134_v17 = vpack.c.bf16 %v133_v15, %v133_v15 }
 0x122   :  { %258 = vmatmul.mubr.msk.bf16.vlgmr.msra.gmra.mrb[0].mxu1 %vm83_vm1, %v134_v17 }
 0x1f5   :  { %v199_v19 = vpop.f32.mrb[0].mxu1 }
 0x1f6   :  { %v200_v20 = vadd.f32 %v235_v18, %v199_v19  ;;  %v259_v21 = vpop.f32.mrb[1].mxu1 }
 0x1f7   :  { %v202_v22 = vpop.f32.mrb[2].mxu1 }
 0x1f8   :  { %v260_v23 = vpop.f32.mrb[3].mxu1  ;;  %v205_v24 = vmul.f32 %v200_v20, %v200_v20 }
 0x1fa   :  { %v206_v25 = vsel %vm83_vm1, %v205_v24, 0.0 }
 0x1fb   :  { %207 = vadd.xlane.f32.xlu0 %v206_v25 }
 0x288   :  { %v208_v26 = vpop.xlane.xlu0 %207 }
 0x289   :  { %v209_v27 = vmax.f32 %v208_v26, 1e-24 }
 0x28b   :  { %273 = vrsqrt.f32 %v209_v27 }
 0x295   :  { %v274_v28 = vpop.eup %273 }
 0x296   :  { %v211_v29 = vmul.f32 %v274_v28, %v200_v20 }
 0x298   :  { %v212_v30 = vpack.c.bf16 %v211_v29, %v211_v29 }
 0x29a   :  { %214 = vst.msk [vmem:[#allocation8] sm:$0xf] %vm213_vm2, %v212_v30 }
 0x29b   :  { %352 = shalt.err (!%p349_p0)
}
 0x29c   :  { %s353_s10 = scalar_lea.hbm %s479_s5, 64 }
 0x29d   :  { %p354_p1 = scmp.ne.s32.totalorder %s479_s5, %s353_s10  ;;  %p357_p2 = scmp.lt.u32.totalorder %s353_s10, %s479_s5 }
 0x29f   :  { %p359_p3 = pnand %p357_p2, %p354_p1 }
 0x2a1   :  { %362 = shalt.err (!%p359_p3)
}
 0x2a2   :  { %224 = dma.vmem_to_hbm [thread:$0]  %s222_s7, 64, %s479_s5, [#allocation4]  }
 0x2a3   :  { %367 = dma.done.wait [#allocation4], 64  }
 0x2a4   :  { %368 = vsyncadd [#allocation4], 4294967232 }
 0x2a5   :  { %228 = vsyncpa [#allocation3], 1 }
 0x2a6   :  { %229 = vsyncpa [#allocation6], 1 }
 0x2a7   :  { %230 = vsyncpa [#allocation4], 1 }

</bundles_post_ra>
